<compile_context>
chip_gen: v7x
topology: tpu7x:2x2x1
jax: 0.10.0
libtpu: 0.0.40
codegen_flags: <defaults>
</compile_context>

<pallas_src>
import functools

import jax
import jax.numpy as jnp
from jax.experimental import pallas as pl
from jax.experimental.pallas import tpu as pltpu

_LANE = 128
# (8192, 128) f32 block = 4 MiB; double-buffered = 8 MiB VMEM (v5e-safe).
_MAX_TILE_ROWS = 8192


def _per_elem_loss(x, gan_type, target_label):
    """Per-element loss in f32; shared by the kernel and the JAX-side tail."""
    if gan_type in ("gan", "ragan"):
        # BCEWithLogitsLoss, specialised on the compile-time-constant target.
        softplus_tail = jnp.log1p(jnp.exp(-jnp.abs(x)))
        if target_label == 1.0:
            return jnp.maximum(-x, 0.0) + softplus_tail      # softplus(-x)
        if target_label == 0.0:
            return jnp.maximum(x, 0.0) + softplus_tail       # softplus(x)
        return jnp.maximum(x, 0.0) - x * target_label + softplus_tail
    if gan_type == "lsgan":
        d = x - target_label                                  # MSELoss
        return d * d
    # wgan-gp: +/- mean(x); the sign is folded into `scale` by the wrapper.
    return x


def _block_partial(x, gan_type, target_label, valid=None):
    """scale-free sum of the per-element loss over one (tile_rows, 128) block."""
    if valid is not None:
        x = jnp.where(valid, x, 0.0)          # zero garbage BEFORE exp/log
    per = _per_elem_loss(x, gan_type, target_label)
    if valid is not None:
        per = jnp.where(valid, per, 0.0)      # zero padded contributions
    col = jnp.sum(per, axis=0, keepdims=True)     # (1, 128): cross-sublane (VPU)
    return jnp.sum(col, axis=1, keepdims=True)    # (1, 1):   cross-lane (XLU)


def _gan_loss_kernel(x_ref, o_ref, *, gan_type, target_label, scale,
                     rows_valid, tile_rows, need_mask):
    """Writes scale * sum(per-element loss over this block's valid rows).

    x_ref: (tile_rows, 128) tile of the lane-aligned flattened input.
    o_ref: (1, 1, 1) per-block scaled partial sum.
    """
    x = x_ref[...].astype(jnp.float32)        # compute in f32 (v5e-safe)

    if not need_mask:
        # Grid divides the rows exactly: no masking anywhere.
        o_ref[0] = _block_partial(x, gan_type, target_label) * scale
    else:
        i = pl.program_id(0)
        is_last = i == pl.num_programs(0) - 1

        # All blocks except the last are fully valid: no mask work at all.
        @pl.when(jnp.logical_not(is_last))
        def _():
            o_ref[0] = _block_partial(x, gan_type, target_label) * scale

        # Only the last block can contain grid-padding rows.
        @pl.when(is_last)
        def _():
            row = jax.lax.broadcasted_iota(jnp.int32, x.shape, 0) + i * tile_rows
            valid = row < rows_valid
            o_ref[0] = _block_partial(x, gan_type, target_label, valid) * scale


def gan_loss(x, target_is_real, *, gan_type="gan",
             real_label_val=1.0, fake_label_val=0.0):
    """Pallas implementation of GANLoss.forward(input, target_is_real)."""
    gan_type = gan_type.lower()
    if gan_type not in ("gan", "ragan", "lsgan", "wgan-gp"):
        raise NotImplementedError(
            "GAN type [{:s}] is not found".format(gan_type))

    if gan_type == "wgan-gp":
        target_label = 0.0                    # unused
        sign = -1.0 if target_is_real else 1.0
    else:
        target_label = float(real_label_val if target_is_real
                             else fake_label_val)
        sign = 1.0

    n = int(x.size)
    scale = sign / float(n)

    flat = x.reshape(-1)                      # free contiguous reshape, native dtype
    rows = n // _LANE
    rem = n % _LANE

    # Inputs smaller than one lane vector: pure JAX, not worth a kernel launch.
    if rows == 0:
        per = _per_elem_loss(flat.astype(jnp.float32), gan_type, target_label)
        return jnp.float32(scale) * jnp.sum(per)

    tail_loss = None
    if rem:
        # <128-element tail summed in JAX; the kernel only sees the aligned
        # prefix, so it never needs a lane mask and no full-array pad copy.
        # TODO(synk): the prefix slice below may still materialize an aligned
        # copy in HBM; fully removing it needs allow_input_fusion or a manual
        # DMA (pl.ANY) path.
        tail = flat[rows * _LANE:].astype(jnp.float32)
        tail_loss = jnp.sum(_per_elem_loss(tail, gan_type, target_label))
        flat = flat[:rows * _LANE]
    x2 = flat.reshape(rows, _LANE)

    # Tile / grid selection: one block if it fits, else >=2 balanced blocks so
    # the "parallel" grid axis can feed both TensorCores on v7x.
    if rows <= _MAX_TILE_ROWS:
        tile_rows, num_blocks = rows, 1
    else:
        num_blocks = pl.cdiv(rows, _MAX_TILE_ROWS)
        if num_blocks % 2:
            num_blocks += 1                   # even, balanced block count
        tile_rows = pl.cdiv(rows, num_blocks)
        tile_rows = pl.cdiv(tile_rows, 16) * 16   # sublane multiple (f32:8, bf16:16)
        num_blocks = pl.cdiv(rows, tile_rows)
    need_mask = (rows % tile_rows) != 0       # only the last block can be ragged

    kernel = functools.partial(
        _gan_loss_kernel,
        gan_type=gan_type,
        target_label=target_label,
        scale=scale,
        rows_valid=rows,
        tile_rows=tile_rows,
        need_mask=need_mask,
    )

    itemsize = int(jnp.dtype(x.dtype).itemsize)
    n_main = rows * _LANE
    if gan_type in ("gan", "ragan"):
        flops, transc = 5 * n_main, 2 * n_main
    elif gan_type == "lsgan":
        flops, transc = 3 * n_main, 0
    else:
        flops, transc = n_main, 0
    cost = pl.CostEstimate(
        flops=flops,
        transcendentals=transc,
        bytes_accessed=n_main * itemsize + num_blocks * 4,
    )

    partials = pl.pallas_call(
        kernel,
        out_shape=jax.ShapeDtypeStruct((num_blocks, 1, 1), jnp.float32),
        grid_spec=pltpu.PrefetchScalarGridSpec(
            num_scalar_prefetch=0,
            grid=(num_blocks,),
            in_specs=[pl.BlockSpec((tile_rows, _LANE), lambda i: (i, 0))],
            out_specs=pl.BlockSpec((1, 1, 1), lambda i: (i, 0, 0)),
        ),
        compiler_params=pltpu.CompilerParams(
            dimension_semantics=("parallel",),
            vmem_limit_bytes=32 * 1024 * 1024),
        cost_estimate=cost,
    )(x2)

    if num_blocks == 1:
        loss = partials.reshape(())           # reduction fully finished in-kernel
    else:
        loss = jnp.sum(partials)              # tiny cross-block reduce

    if tail_loss is not None:
        loss = loss + jnp.float32(scale) * tail_loss
    return loss


def _gan_loss_ref(x, target_is_real, *, gan_type="gan",
                  real_label_val=1.0, fake_label_val=0.0):
    """Pure-JAX reference mirroring the PyTorch module."""
    gan_type = gan_type.lower()
    x = x.astype(jnp.float32)
    if gan_type == "wgan-gp":
        m = jnp.mean(x)
        return -m if target_is_real else m
    t = real_label_val if target_is_real else fake_label_val
    t = jnp.full_like(x, t)
    if gan_type in ("gan", "ragan"):
        per = jnp.maximum(x, 0.0) - x * t + jnp.log1p(jnp.exp(-jnp.abs(x)))
    else:  # lsgan
        per = (x - t) ** 2
    return jnp.mean(per)


if __name__ == "__main__":
    key = jax.random.PRNGKey(0)
    ks = jax.random.split(key, 5)
    cases = [
        # Canonical small discriminator output, NCHW.
        jax.random.normal(ks[0], (2, 4, 16, 16), dtype=jnp.float32),
        # Ragged size (not a multiple of 128) -> exercises the JAX tail path.
        jax.random.normal(ks[1], (3, 3, 7, 5), dtype=jnp.float32),
        # Larger input -> single big lane-dense block.
        jax.random.normal(ks[2], (2, 16, 96, 96), dtype=jnp.float32),
        # >1M elements -> 2 balanced blocks + masked last block.
        jax.random.normal(ks[3], (2, 4, 375, 384), dtype=jnp.float32),
        # bf16 discriminator output (in-kernel f32 cast).
        jax.random.normal(ks[4], (2, 4, 16, 16), dtype=jnp.float32).astype(jnp.bfloat16),
    ]

    ok = True
    for xin in cases:
        for gt in ("gan", "ragan", "lsgan", "wgan-gp"):
            for target_is_real in (True, False):
                got = jax.block_until_ready(
                    gan_loss(xin, target_is_real, gan_type=gt))
                ref = jax.block_until_ready(
                    _gan_loss_ref(xin, target_is_real, gan_type=gt))
                if not jnp.allclose(got, ref, rtol=1e-5, atol=1e-5):
                    ok = False
                    print("MISMATCH", xin.shape, xin.dtype, gt, target_is_real,
                          float(got), float(ref))

    if ok:
        print("KERNEL_OK")
</pallas_src>

<mosaic_0001>
module attributes {stable_mosaic.version = 11 : i64} {
  func.func @_gan_loss_kernel(%arg0: i32, %arg1: memref<16x128xf32, #tpu.memory_space<vmem>>, %arg2: memref<1x1x1xf32, #tpu.memory_space<vmem>>) attributes {dimension_semantics = [#tpu.dimension_semantics<parallel>], iteration_bounds = array<i64: 1>, scalar_prefetch = 0 : i64, scratch_operands = 0 : i64, tpu.core_type = #tpu.core_type<tc>, window_params = [{transform_indices = @transform_0, window_bounds = array<i64: 16, 128>}, {transform_indices = @transform_1, window_bounds = array<i64: 1, 1, 1>}]} {
    %c0 = arith.constant 0 : index
    %c0_0 = arith.constant 0 : index
    %0 = vector.load %arg1[%c0, %c0_0] : memref<16x128xf32, #tpu.memory_space<vmem>>, vector<16x128xf32>
    %1 = math.absf %0 : vector<16x128xf32>
    %cst = arith.constant 0.000000e+00 : f32
    %2 = vector.broadcast %cst : f32 to vector<16x128xf32>
    %3 = arith.subf %2, %1 : vector<16x128xf32>
    %4 = math.exp %3 : vector<16x128xf32>
    %5 = math.log1p %4 : vector<16x128xf32>
    %cst_1 = arith.constant 0.000000e+00 : f32
    %6 = vector.broadcast %cst_1 : f32 to vector<16x128xf32>
    %7 = arith.subf %6, %0 : vector<16x128xf32>
    %cst_2 = arith.constant 0.000000e+00 : f32
    %8 = vector.broadcast %cst_2 : f32 to vector<16x128xf32>
    %9 = arith.maximumf %7, %8 : vector<16x128xf32>
    %10 = arith.addf %9, %5 : vector<16x128xf32>
    %cst_3 = arith.constant dense<0.000000e+00> : vector<128xf32>
    %11 = vector.multi_reduction <add>, %10, %cst_3 [0] : vector<16x128xf32> to vector<128xf32>
    %12 = vector.shape_cast %11 : vector<128xf32> to vector<1x128xf32>
    %cst_4 = arith.constant dense<0.000000e+00> : vector<1xf32>
    %13 = vector.multi_reduction <add>, %12, %cst_4 [1] : vector<1x128xf32> to vector<1xf32>
    %14 = vector.shape_cast %13 : vector<1xf32> to vector<1x1xf32>
    %cst_5 = arith.constant 4.8828125E-4 : f32
    %15 = vector.broadcast %cst_5 : f32 to vector<1x1xf32>
    %16 = arith.mulf %14, %15 : vector<1x1xf32>
    %c0_6 = arith.constant 0 : index
    %c0_7 = arith.constant 0 : index
    %c0_8 = arith.constant 0 : index
    %17 = vector.load %arg2[%c0_6, %c0_7, %c0_8] : memref<1x1x1xf32, #tpu.memory_space<vmem>>, vector<1x1x1xf32>
    %18 = vector.shape_cast %17 : vector<1x1x1xf32> to vector<1x1xf32>
    %19 = vector.shape_cast %16 : vector<1x1xf32> to vector<1x1x1xf32>
    tpu.vector_store %arg2[%c0_6, %c0_7, %c0_8], %19 {strides = array<i32>} : memref<1x1x1xf32, #tpu.memory_space<vmem>>, vector<1x1x1xf32>,
    return
  }
  func.func @transform_0(%arg0: i32) -> (i32, i32) {
    %c0_i32 = arith.constant 0 : i32
    %c0_i32_0 = arith.constant 0 : i32
    return %arg0, %c0_i32 : i32, i32
  }
  func.func @transform_1(%arg0: i32) -> (i32, i32, i32) {
    %c0_i32 = arith.constant 0 : i32
    %c0_i32_0 = arith.constant 0 : i32
    %c0_i32_1 = arith.constant 0 : i32
    return %arg0, %c0_i32, %c0_i32_0 : i32, i32, i32
  }
}

</mosaic_0001>

<bundles_post_ra>
// kernel: tpu_custom_call.1
= control target key start
LH: loop header
LB: loop body
LE: loop exit
PB: predicated region body
PF: predicated region fallthrough
CT: control target
= control target key end

     0   :  { %6 = vsyncpa [#allocation3], 0  ;;  %s182_s0 = inlined_call_operand.hbm [shape: f32[16,128], index: 0, kind: input, shape index: {}]   ;;  %s183_s1 = inlined_call_operand.hbm [shape: f32[1,1,1], index: 1, kind: output, shape index: {}]  }
   0x1   :  { %7 = vsyncpa [#allocation4], 0  ;;  %s144_s6 = smov [#allocation2]   ;;  %s96_s10 = scalar_lea.hbm %s182_s0, 256 }
   0x2   :  { %s13_s7 = sshll.u32 %s144_s6, 4  ;;  %p97_p0 = scmp.ne.s32.totalorder %s182_s0, %s96_s10  ;;  %s14_s7 = int_to_ptr.vmem [resolvable:$true] %s13_s7 }
   0x3   :  { %p100_p1 = scmp.lt.u32.totalorder %s96_s10, %s182_s0 }
   0x5   :  { %p102_p2 = pnand %p100_p1, %p97_p0 }
   0x7   :  { %105 = shalt.err (!%p102_p2)
}
   0x8   :  { %s106_s15 = scalar_lea.vmem %s14_s7, 256  ;;  %p111_p4 = scmp.lt.s32.totalorder %s14_s7, %s14_s7 }
   0x9   :  { %p107_p3 = scmp.ne.s32.totalorder %s14_s7, %s106_s15  ;;  %p112_p5 = scmp.lt.s32.totalorder %s106_s15, %s106_s15 }
   0xb   :  { %p113_p6 = por %p112_p5, %p111_p4 }
   0xd   :  { %p114_p7 = pnand %p113_p6, %p107_p3 }
   0xf   :  { %117 = shalt.err (!%p114_p7)
}
  0x10   :  { %s145_s16 = smov 128   ;;  %s146_s17 = smov 8  }
  0x11   :  { %19 = dma.hbm_to_vmem [thread:$0]  %s182_s0, 256, %s14_s7, [#allocation3], %s145_s16, %s145_s16, %s146_s17  }
  0x12   :  { %140 = dma.done.wait [#allocation3], 256  }
  0x13   :  { %141 = vsyncadd [#allocation3], 4294967040  ;;  %v23_v0 = vld [vmem:[#allocation2] sm:$0xff]  ;;  %v24_v1 = vld [vmem:[#allocation2 + $0x8] sm:$0xff]  ;;  %s147_s0 = smov [#allocation5]   ;;  %vm67_vm2 = vcmask 0  }
  0x14   :  { %v25_v2 = vand.u32 2147483647, %v23_v0  ;;  %v26_v3 = vand.u32 2147483647, %v24_v1  ;;  %v51_v17 = vsub.f32 0.0, %v23_v0  ;;  %v52_v19 = vsub.f32 0.0, %v24_v1 }
  0x15   :  { %s75_s20 = sshll.u32 %s147_s0, 4  ;;  %s76_s20 = int_to_ptr.vmem [resolvable:$true] %s75_s20 }
  0x16   :  { %v27_v4 = vsub.f32 0.0, %v25_v2  ;;  %v28_v5 = vsub.f32 0.0, %v26_v3  ;;  %v53_v23 = vmax.f32 %v51_v17, 0.0  ;;  %v54_v26 = vmax.f32 %v52_v19, 0.0  ;;  %s118_s21 = scalar_lea.vmem %s76_s20, 16  ;;  %s122_s22 = scalar_lea.vmem %s76_s20, 32 }
  0x17   :  { %p119_p8 = scmp.ne.s32.totalorder %s76_s20, %s118_s21  ;;  %p123_p9 = scmp.lt.s32.totalorder %s76_s20, %s76_s20 }
  0x18   :  { %v29_v6 = vmul.f32 1.442695, %v27_v4  ;;  %v31_v7 = vmul.f32 1.442695, %v28_v5  ;;  %p124_p10 = scmp.lt.s32.totalorder %s122_s22, %s118_s21 }
  0x1a   :  { %88 = vpow2.f32 %v29_v6  ;;  %p125_p11 = por %p124_p10, %p123_p9 }
  0x1b   :  { %90 = vpow2.f32 %v31_v7 }
  0x1c   :  { %p126_p12 = pnand %p125_p11, %p119_p8 }
  0x24   :  { %v89_v8 = vpop.eup %88 }
  0x25   :  { %v91_v9 = vpop.eup %90  ;;  %v33_v10 = vadd.f32 1.0, %v89_v8  ;;  %v36_v12 = vmul.f32 -0.5, %v89_v8  ;;  %v39_v15 = vand.u32 2147483647, %v89_v8 }
  0x26   :  { %v42_v11 = vadd.f32 1.0, %v91_v9  ;;  %v45_v13 = vmul.f32 -0.5, %v91_v9  ;;  %v48_v18 = vand.u32 2147483647, %v91_v9 }
  0x27   :  { %92 = vlog2.f32 %v33_v10  ;;  %v37_v14 = vadd.f32 1.0, %v36_v12  ;;  %vm40_vm0 = vcmp.lt.f32.partialorder %v39_v15, 0.0004427343 }
  0x28   :  { %94 = vlog2.f32 %v42_v11  ;;  %v46_v16 = vadd.f32 1.0, %v45_v13  ;;  %vm49_vm1 = vcmp.lt.f32.partialorder %v48_v18, 0.0004427343 }
  0x29   :  { %v38_v20 = vmul.f32 %v89_v8, %v37_v14 }
  0x2a   :  { %v47_v22 = vmul.f32 %v91_v9, %v46_v16 }
  0x31   :  { %v93_v21 = vpop.eup %92 }
  0x32   :  { %v95_v24 = vpop.eup %94  ;;  %v35_v25 = vmul.f32 0.6931472, %v93_v21 }
  0x33   :  { %v44_v27 = vmul.f32 0.6931472, %v95_v24 }
  0x34   :  { %v41_v28 = vsel %vm40_vm0, %v38_v20, %v35_v25 }
  0x35   :  { %v50_v29 = vsel %vm49_vm1, %v47_v22, %v44_v27  ;;  %v55_v30 = vadd.f32 %v53_v23, %v41_v28 }
  0x36   :  { %v56_v31 = vadd.f32 %v54_v26, %v50_v29 }
  0x38   :  { %v57_v32 = vadd.f32 %v56_v31, %v55_v30 }
  0x3a   :  { %v58_v33 = vrot.slane %v57_v32, 4 }
  0x3c   :  { %v59_v34 = vadd.f32 %v58_v33, %v57_v32 }
  0x3e   :  { %v60_v35 = vrot.slane %v59_v34, 2 }
  0x40   :  { %v61_v36 = vadd.f32 %v60_v35, %v59_v34 }
  0x42   :  { %v62_v37 = vrot.slane %v61_v36, 1 }
  0x44   :  { %v63_v38 = vadd.f32 %v62_v37, %v61_v36 }
  0x46   :  { %64 = vadd.xlane.f32.xlu0 %v63_v38 }
  0xd3   :  { %v65_v39 = vpop.xlane.xlu0 %64 }
  0xd4   :  { %v66_v40 = vmul.f32 0.00048828125, %v65_v39 }
  0xd6   :  { %68 = vst.msk [vmem:[#allocation5] sm:$0x1] %vm67_vm2, %v66_v40 }
  0xd7   :  { %129 = shalt.err (!%p126_p12)
}
  0xd8   :  { %s130_s25 = scalar_lea.hbm %s183_s1, 16 }
  0xd9   :  { %p131_p13 = scmp.ne.s32.totalorder %s183_s1, %s130_s25  ;;  %p134_p0 = scmp.lt.u32.totalorder %s130_s25, %s183_s1 }
  0xdb   :  { %p136_p1 = pnand %p134_p0, %p131_p13 }
  0xdd   :  { %139 = shalt.err (!%p136_p1)
}
  0xde   :  { %78 = dma.vmem_to_hbm [thread:$0]  %s76_s20, 16, %s183_s1, [#allocation4]  }
  0xdf   :  { %142 = dma.done.wait [#allocation4], 16  }
  0xe0   :  { %143 = vsyncadd [#allocation4], 4294967280 }
  0xe1   :  { %82 = vsyncpa [#allocation3], 1 }
  0xe2   :  { %83 = vsyncpa [#allocation4], 1 }

</bundles_post_ra>
